<compile_context>
chip_gen: v6e
topology: v6e:2x2x1
jax: 0.10.0
libtpu: 0.0.40
codegen_flags: <defaults>
</compile_context>

<pallas_src>
import jax
import jax.numpy as jnp
from jax.experimental import pallas as pl
from jax.experimental.pallas import tpu as pltpu


def linear_sub_kernel(x_ref, w_ref, b_ref, o_ref):
    # x_ref: (B, IN), w_ref: (OUT, IN) [PyTorch layout], b_ref: (1, OUT), o_ref: (B, OUT)
    # Contract x dim 1 against w dim 1 -> (B, OUT); no transpose materialized.
    acc = jax.lax.dot_general(
        x_ref[...],
        w_ref[...],
        dimension_numbers=(((1,), (1,)), ((), ())),
        preferred_element_type=jnp.float32,
    )
    # bias already has the -50 folded in.
    o_ref[...] = (acc + b_ref[...]).astype(o_ref.dtype)


def linear_minus_50(x, weight, bias):
    B, IN = x.shape
    OUT = weight.shape[0]
    # Fold the constant subtraction into the (static) bias parameter.
    bias_fused = (bias - 50.0).reshape(1, OUT)

    # Shapes are tiny (~22 KB total): single gridless invocation, everything in VMEM.
    return pl.pallas_call(
        linear_sub_kernel,
        out_shape=jax.ShapeDtypeStruct((B, OUT), x.dtype),
        in_specs=[
            pl.BlockSpec(memory_space=pltpu.MemorySpace.VMEM),
            pl.BlockSpec(memory_space=pltpu.MemorySpace.VMEM),
            pl.BlockSpec(memory_space=pltpu.MemorySpace.VMEM),
        ],
        out_specs=pl.BlockSpec(memory_space=pltpu.MemorySpace.VMEM),
    )(x, weight, bias_fused)


if __name__ == "__main__":
    key = jax.random.PRNGKey(0)
    kx, kw, kb = jax.random.split(key, 3)

    B, IN, OUT = 4, 100, 50

    # Deterministic example input (matches torch.randn(4, 100) shape).
    x = jax.random.normal(kx, (B, IN), dtype=jnp.float32)

    # Deterministic parameter init, PyTorch Linear style: U(-1/sqrt(IN), 1/sqrt(IN)).
    bound = 1.0 / jnp.sqrt(jnp.float32(IN))
    weight = jax.random.uniform(kw, (OUT, IN), dtype=jnp.float32,
                                minval=-bound, maxval=bound)
    bias = jax.random.uniform(kb, (OUT,), dtype=jnp.float32,
                              minval=-bound, maxval=bound)

    y = linear_minus_50(x, weight, bias)
    jax.block_until_ready(y)

    # Correctness check against plain-JAX reference.
    y_ref = x @ weight.T + bias - 50.0
    assert y.shape == (B, OUT)
    assert jnp.allclose(y, y_ref, atol=1e-4, rtol=1e-4)

    print("KERNEL_OK")
</pallas_src>

<mosaic_0001>
module attributes {stable_mosaic.version = 11 : i64} {
  func.func @linear_sub_kernel(%arg0: memref<4x100xf32, #tpu.memory_space<vmem>>, %arg1: memref<50x100xf32, #tpu.memory_space<vmem>>, %arg2: memref<1x50xf32, #tpu.memory_space<vmem>>, %arg3: memref<4x50xf32, #tpu.memory_space<vmem>>) attributes {dimension_semantics = [], scalar_prefetch = 0 : i64, scratch_operands = 0 : i64, tpu.core_type = #tpu.core_type<tc>} {
    %c0 = arith.constant 0 : index
    %c0_0 = arith.constant 0 : index
    %0 = vector.load %arg0[%c0, %c0_0] : memref<4x100xf32, #tpu.memory_space<vmem>>, vector<4x100xf32>
    %c0_1 = arith.constant 0 : index
    %c0_2 = arith.constant 0 : index
    %1 = vector.load %arg1[%c0_1, %c0_2] : memref<50x100xf32, #tpu.memory_space<vmem>>, vector<50x100xf32>
    %cst = arith.constant dense<0.000000e+00> : vector<4x50xf32>
    %2 = tpu.matmul %0, %1, %cst {dimension_numbers = #tpu.dot_dimension_numbers<[1], [1], [0], [0], [0, 0, 1, 0], [], []>} : vector<4x100xf32>, vector<50x100xf32>, vector<4x50xf32> -> vector<4x50xf32>
    %c0_3 = arith.constant 0 : index
    %c0_4 = arith.constant 0 : index
    %3 = vector.load %arg2[%c0_3, %c0_4] : memref<1x50xf32, #tpu.memory_space<vmem>>, vector<1x50xf32>
    %4 = vector.broadcast %3 : vector<1x50xf32> to vector<4x50xf32>
    %5 = arith.addf %2, %4 : vector<4x50xf32>
    %c0_5 = arith.constant 0 : index
    %c0_6 = arith.constant 0 : index
    %6 = vector.load %arg3[%c0_5, %c0_6] : memref<4x50xf32, #tpu.memory_space<vmem>>, vector<4x50xf32>
    tpu.vector_store %arg3[%c0_5, %c0_6], %5 {strides = array<i32>} : memref<4x50xf32, #tpu.memory_space<vmem>>, vector<4x50xf32>,
    return
  }
}

</mosaic_0001>

<bundles_post_ra>
// kernel: tpu_custom_call.1
= control target key start
LH: loop header
LB: loop body
LE: loop exit
PB: predicated region body
PF: predicated region fallthrough
CT: control target
= control target key end

     0   :  { %8 = vsyncpa [#allocation3], 0  ;;  %s323_s0 = inlined_call_operand.hbm [shape: f32[4,100], index: 0, kind: input, shape index: {}]   ;;  %s324_s1 = inlined_call_operand.hbm [shape: f32[50,100], index: 1, kind: input, shape index: {}]   ;;  %s325_s2 = inlined_call_operand.vmem [shape: f32[1,50], index: 2, kind: input, shape index: {}]   ;;  %s326_s3 = inlined_call_operand.hbm [shape: f32[4,50], index: 3, kind: output, shape index: {}]  }
   0x1   :  { %9 = vsyncpa [#allocation6], 0 }
   0x2   :  { %10 = vsyncpa [#allocation4], 0  ;;  %s276_s12 = smov [#allocation2]   ;;  %s277_s14 = smov [#allocation5]  }
   0x3   :  { %s17_s13 = sshll.u32 %s276_s12, 4  ;;  %s26_s15 = sshll.u32 %s277_s14, 4  ;;  %s18_s13 = int_to_ptr.vmem [resolvable:$true] %s17_s13  ;;  %s27_s15 = int_to_ptr.vmem [resolvable:$true] %s26_s15 }
   0x4   :  { %s218_s16 = scalar_lea.vmem %s18_s13, 64  ;;  %p223_p1 = scmp.lt.s32.totalorder %s18_s13, %s18_s13 }
   0x5   :  { %p219_p0 = scmp.ne.s32.totalorder %s18_s13, %s218_s16  ;;  %p224_p2 = scmp.lt.s32.totalorder %s218_s16, %s218_s16 }
   0x7   :  { %p225_p3 = por %p224_p2, %p223_p1 }
   0x9   :  { %p226_p4 = pnand %p225_p3, %p219_p0 }
   0xb   :  { %229 = shalt.err (!%p226_p4)
}
   0xc   :  { %20 = dma.hbm_to_vmem [thread:$0]  %s323_s0, 64, %s18_s13, [#allocation3]  }
   0xd   :  { %s238_s19 = scalar_lea.vmem %s27_s15, 896  ;;  %p243_p6 = scmp.lt.s32.totalorder %s27_s15, %s27_s15 }
   0xe   :  { %p239_p5 = scmp.ne.s32.totalorder %s27_s15, %s238_s19  ;;  %p244_p7 = scmp.lt.s32.totalorder %s238_s19, %s238_s19 }
  0x10   :  { %p245_p8 = por %p244_p7, %p243_p6 }
  0x12   :  { %p246_p9 = pnand %p245_p8, %p239_p5 }
  0x14   :  { %249 = shalt.err (!%p246_p9)
}
  0x15   :  { %s278_s20 = smov 128   ;;  %s279_s21 = smov 8  }
  0x16   :  { %32 = dma.hbm_to_vmem [thread:$0]  %s324_s1, 896, %s27_s15, [#allocation6], %s278_s20, %s278_s20, %s279_s21  }
  0x17   :  { %270 = dma.done.wait [#allocation3], 64  }
  0x18   :  { %271 = vsyncadd [#allocation3], 4294967232 }
  0x19   :  { %272 = dma.done.wait [#allocation6], 896  }
  0x1a   :  { %273 = vsyncadd [#allocation6], 4294966400  ;;  %v280_v0 = vmov 0.0   ;;  %vm281_vm0 = vmmov 0   ;;  %vm56_vm1 = vcmask 818176   ;;  %v47_v2 = vld [vmem:[#allocation5 + $0x28] sm:$0xff] }
  0x1b   :  { %186 = vmatprep.subr.mxu0 %v280_v0  ;;  %200 = vmatprep.mubr.msk.f32.mxu0 %vm281_vm0, %v280_v0  ;;  %v48_v1 = vld [vmem:[#allocation5 + $0x30] sm:$0x3]  ;;  %v46_v3 = vld [vmem:[#allocation5 + $0x20] sm:$0xff]  ;;  %v45_v4 = vld [vmem:[#allocation5 + $0x18] sm:$0xff]  ;;  %s282_s24 = smov [#allocation7]   ;;  %vm151_vm2 = vcmask 404480  }
  0x1c   :  { %187 = vmatpush3.xpose.msk.msra.mxu0 %vm56_vm1, %v48_v1  ;;  %v44_v5 = vld [vmem:[#allocation5 + $0x10] sm:$0xff]  ;;  %v43_v6 = vld [vmem:[#allocation5 + $0x8] sm:$0xff]  ;;  %v42_v7 = vld [vmem:[#allocation5] sm:$0xff]  ;;  %s159_s25 = sshll.u32 %s282_s24, 4  ;;  %s160_s25 = int_to_ptr.vmem [resolvable:$true] %s159_s25 }
  0x1d   :  { %188 = vmatprep.subr.mxu0 %v280_v0  ;;  %v41_v8 = vld [vmem:[#allocation2] sm:$0xf]  ;;  %s250_s26 = scalar_lea.vmem %s160_s25, 64  ;;  %p255_p11 = scmp.lt.s32.totalorder %s160_s25, %s160_s25 }
  0x1e   :  { %v169_v9 = vld [vmem:[%s325_s2] ss:$0 sm:$0xff]  ;;  %p251_p10 = scmp.ne.s32.totalorder %s160_s25, %s250_s26  ;;  %p256_p12 = scmp.lt.s32.totalorder %s250_s26, %s250_s26 }
  0x20   :  { %189 = vmatpush3.xpose.msk.msra.mxu0 %vm56_vm1, %v47_v2  ;;  %p257_p13 = por %p256_p12, %p255_p11 }
  0x21   :  { %190 = vmatprep.subr.mxu0 %v280_v0 }
  0x22   :  { %p258_p0 = pnand %p257_p13, %p251_p10 }
  0x24   :  { %191 = vmatpush3.xpose.msk.msra.mxu0 %vm56_vm1, %v46_v3 }
  0x25   :  { %192 = vmatprep.subr.mxu0 %v280_v0 }
  0x28   :  { %193 = vmatpush3.xpose.msk.msra.mxu0 %vm56_vm1, %v45_v4 }
  0x29   :  { %194 = vmatprep.subr.mxu0 %v280_v0 }
  0x2c   :  { %195 = vmatpush3.xpose.msk.msra.mxu0 %vm56_vm1, %v44_v5 }
  0x2d   :  { %196 = vmatprep.subr.mxu0 %v280_v0 }
  0x30   :  { %197 = vmatpush3.xpose.msk.msra.mxu0 %vm56_vm1, %v43_v6 }
  0x31   :  { %198 = vmatprep.subr.mxu0 %v280_v0 }
  0x34   :  { %199 = vmatpush3.xpose.msk.msra.mxu0 %vm56_vm1, %v42_v7 }
  0x37   :  { %201 = vmatmul.mubr.msk.f32.vlgmr.msra.gmra.mxu0 %vm56_vm1, %v41_v8 }
  0xf7   :  { %v147_v10 = vpop.f32.mrf.mxu0 }
  0xf8   :  { %v148_v11 = vadd.f32 %v169_v9, %v147_v10 }
  0xf9   :  { %v202_v12 = vpop.f32.mrf.mxu0 }
  0xfa   :  { %152 = vst.msk [vmem:[#allocation7] sm:$0xf] %vm151_vm2, %v148_v11 }
  0xfb   :  { %261 = shalt.err (!%p258_p0)
}
  0xfc   :  { %162 = dma.vmem_to_hbm [thread:$0]  %s160_s25, 64, %s326_s3, [#allocation4]  }
  0xfd   :  { %274 = dma.done.wait [#allocation4], 64  }
  0xfe   :  { %275 = vsyncadd [#allocation4], 4294967232 }
  0xff   :  { %166 = vsyncpa [#allocation3], 1 }
 0x100   :  { %167 = vsyncpa [#allocation6], 1 }
 0x101   :  { %168 = vsyncpa [#allocation4], 1 }

</bundles_post_ra>
